<compile_context>
chip_gen: v7x
topology: tpu7x:2x2x1
jax: 0.10.0
libtpu: 0.0.40
codegen_flags: <defaults>
</compile_context>

<pallas_src>
import jax
import jax.numpy as jnp
from jax.experimental import pallas as pl
from jax.experimental.pallas import tpu as pltpu

# ----------------------------------------------------------------------------
# Problem sizes (small, consistent with the module's "mnist-gan"-style forward)
# ----------------------------------------------------------------------------
B = 8             # batch of latents
Z = 32            # latent dim
C, H, W = 3, 16, 16
D = C * H * W     # flattened image size = 768 (multiple of 128)
NC = 10           # number of classes (softmax branch, non-celeba classifier)
NCP = 128         # lane-padded class dim (unmasked 128-lane stores)
NEG = -1e30       # pad-logit value -> exp underflows to 0 in the softmax


def cls_reward_kernel(inv_beta_ref, z_ref, wg_ref, bg_ref, wc_ref, bc_ref,
                      logits_ref, allp_ref, img_ref):
    inv_beta = inv_beta_ref[0, 0]

    # --- generator: x_pred = tanh(z @ Wg + bg), values in [-1, 1] ------------
    x = jnp.tanh(
        jnp.dot(z_ref[...], wg_ref[...], preferred_element_type=jnp.float32)
        + bg_ref[...]
    )

    # --- classifier: logits = (x @ Wc_pad + bc_pad) * (1/beta) ---------------
    # Wc is zero-padded / bc is -1e30-padded to 128 lanes, so the store below
    # is a full-width unmasked vst and pad columns vanish under softmax.
    logits = (
        jnp.dot(x, wc_ref[...], preferred_element_type=jnp.float32)
        + bc_ref[...]
    ) * inv_beta
    logits_ref[...] = logits

    # --- softmax over classes (non-celeba branch of ClsReward.forward) -------
    m = jnp.max(logits, axis=1, keepdims=True)
    e = jnp.exp(logits - m)                       # pad lanes -> exp(-huge) = 0
    denom = jnp.sum(e, axis=1, keepdims=True)
    allp_ref[...] = e / denom                     # exact softmax (no approx)

    # --- images = x_pred * 0.5 + 0.5 ------------------------------------------
    img_ref[...] = x * 0.5 + 0.5


def _out_shapes(batch):
    return (
        jax.ShapeDtypeStruct((batch, NCP), jnp.float32),   # padded logits
        jax.ShapeDtypeStruct((batch, NCP), jnp.float32),   # padded all_probas
        jax.ShapeDtypeStruct((batch, D), jnp.float32),     # flattened images
    )


def _call_gridless(inv_beta, latents, wg, bg, wc_p, bc_p):
    """Small batch: one kernel invocation, no grid, no pipeline overhead."""
    batch = latents.shape[0]
    return pl.pallas_call(
        cls_reward_kernel,
        out_shape=_out_shapes(batch),
        in_specs=[
            pl.BlockSpec(memory_space=pltpu.SMEM),     # 1/beta scalar
            pl.BlockSpec(memory_space=pltpu.VMEM),     # latents
            pl.BlockSpec(memory_space=pltpu.VMEM),     # Wg
            pl.BlockSpec(memory_space=pltpu.VMEM),     # bg
            pl.BlockSpec(memory_space=pltpu.VMEM),     # Wc (padded)
            pl.BlockSpec(memory_space=pltpu.VMEM),     # bc (padded)
        ],
        out_specs=(
            pl.BlockSpec(memory_space=pltpu.VMEM),
            pl.BlockSpec(memory_space=pltpu.VMEM),
            pl.BlockSpec(memory_space=pltpu.VMEM),
        ),
    )(inv_beta, latents, wg, bg, wc_p, bc_p)


def _call_tiled(inv_beta, latents, wg, bg, wc_p, bc_p, tb):
    """Large batch: batch-parallel grid (weights stay resident via (0,0) maps)."""
    batch = latents.shape[0]
    return pl.pallas_call(
        cls_reward_kernel,
        out_shape=_out_shapes(batch),
        grid=(batch // tb,),
        in_specs=[
            pl.BlockSpec(memory_space=pltpu.SMEM),               # 1/beta
            pl.BlockSpec((tb, Z), lambda i: (i, 0)),             # latents tile
            pl.BlockSpec((Z, D), lambda i: (0, 0)),              # Wg (resident)
            pl.BlockSpec((1, D), lambda i: (0, 0)),              # bg
            pl.BlockSpec((D, NCP), lambda i: (0, 0)),            # Wc (resident)
            pl.BlockSpec((1, NCP), lambda i: (0, 0)),            # bc
        ],
        out_specs=(
            pl.BlockSpec((tb, NCP), lambda i: (i, 0)),
            pl.BlockSpec((tb, NCP), lambda i: (i, 0)),
            pl.BlockSpec((tb, D), lambda i: (i, 0)),
        ),
        compiler_params=pltpu.CompilerParams(
            dimension_semantics=("parallel",)    # v7x: shard batch across TCs
        ),
    )(inv_beta, latents, wg, bg, wc_p, bc_p)


def cls_reward_forward(latents, wg, bg, wc, bc, beta=1.0, batch_tile=128):
    """Same dict as ClsReward.forward (softmax classifier path)."""
    batch = latents.shape[0]

    # Lane-pad the classifier params once: zero weight columns, -1e30 bias so
    # the padded logits never win the softmax (exp underflows to exactly 0).
    wc_p = jnp.zeros((D, NCP), jnp.float32).at[:, :NC].set(wc)
    bc_p = jnp.full((1, NCP), NEG, jnp.float32).at[:, :NC].set(bc)

    inv_beta = jnp.full((1, 1), 1.0 / beta, dtype=jnp.float32)

    if batch > batch_tile and batch % batch_tile == 0:
        logits_p, allp_p, img_flat = _call_tiled(
            inv_beta, latents, wg, bg, wc_p, bc_p, batch_tile)
    else:
        logits_p, allp_p, img_flat = _call_gridless(
            inv_beta, latents, wg, bg, wc_p, bc_p)

    logits = logits_p[:, :NC]
    all_probas = allp_p[:, :NC]

    # Tiny per-row reductions on an (B, NC) array: do them in plain JAX
    # (XLU work over a 118/128-pad vreg inside the kernel was pure waste).
    probas = jnp.max(all_probas, axis=1)
    classes = jnp.argmax(logits, axis=1).astype(jnp.int32)   # exp is monotone

    return {
        "logits": logits,
        "probas": probas,
        "all_probas": all_probas,
        "classes": classes,
        "images": img_flat.reshape(batch, C, H, W),   # NCHW, matches PyTorch
    }


def _reference_forward(latents, wg, bg, wc, bc, beta=1.0):
    x = jnp.tanh(latents @ wg + bg)
    logits = (x @ wc + bc) / beta
    all_probas = jax.nn.softmax(logits, axis=1)
    return {
        "logits": logits,
        "probas": jnp.max(all_probas, axis=1),
        "all_probas": all_probas,
        "classes": jnp.argmax(logits, axis=1).astype(jnp.int32),
        "images": (x * 0.5 + 0.5).reshape(latents.shape[0], C, H, W),
    }


if __name__ == "__main__":
    key = jax.random.PRNGKey(0)
    k_lat, k_wg, k_bg, k_wc, k_bc = jax.random.split(key, 5)

    latents = jax.random.normal(k_lat, (B, Z), dtype=jnp.float32)
    # deterministic synthetic parameters (no checkpoint loading)
    wg = 0.1 * jax.random.normal(k_wg, (Z, D), dtype=jnp.float32)
    bg = 0.01 * jax.random.normal(k_bg, (1, D), dtype=jnp.float32)
    wc = 0.1 * jax.random.normal(k_wc, (D, NC), dtype=jnp.float32)
    bc = 0.01 * jax.random.normal(k_bc, (1, NC), dtype=jnp.float32)

    out = cls_reward_forward(latents, wg, bg, wc, bc, beta=1.0)
    jax.block_until_ready(out)

    # light correctness check against plain-JAX reference (loose tol: MXU f32
    # matmul passes vs XLA default precision differ slightly)
    ref = _reference_forward(latents, wg, bg, wc, bc, beta=1.0)
    assert bool(jnp.allclose(out["all_probas"], ref["all_probas"],
                             rtol=2e-2, atol=2e-2))
    assert bool(jnp.allclose(out["images"], ref["images"],
                             rtol=2e-2, atol=2e-2))

    # TODO(synk): celeba sigmoid branch and reward aggregation helpers
    # (get_reward, log_reward, get_precision) are thin reductions on top of
    # `all_probas`/`logits`; they stay in plain JAX — only the forward hot
    # path (generator + classifier + softmax + image rescale) is kernelized.
    print("KERNEL_OK")
</pallas_src>

<mosaic_0001>
module attributes {stable_mosaic.version = 11 : i64} {
  func.func @cls_reward_kernel(%arg0: memref<1x1xf32, #tpu.memory_space<smem>>, %arg1: memref<8x32xf32, #tpu.memory_space<vmem>>, %arg2: memref<32x768xf32, #tpu.memory_space<vmem>>, %arg3: memref<1x768xf32, #tpu.memory_space<vmem>>, %arg4: memref<768x128xf32, #tpu.memory_space<vmem>>, %arg5: memref<1x128xf32, #tpu.memory_space<vmem>>, %arg6: memref<8x128xf32, #tpu.memory_space<vmem>>, %arg7: memref<8x128xf32, #tpu.memory_space<vmem>>, %arg8: memref<8x768xf32, #tpu.memory_space<vmem>>) attributes {dimension_semantics = [], scalar_prefetch = 0 : i64, scratch_operands = 0 : i64, tpu.core_type = #tpu.core_type<tc>} {
    %c0 = arith.constant 0 : index
    %c0_0 = arith.constant 0 : index
    %0 = memref.load %arg0[%c0, %c0_0] : memref<1x1xf32, #tpu.memory_space<smem>>
    %c0_1 = arith.constant 0 : index
    %c0_2 = arith.constant 0 : index
    %1 = vector.load %arg1[%c0_1, %c0_2] : memref<8x32xf32, #tpu.memory_space<vmem>>, vector<8x32xf32>
    %c0_3 = arith.constant 0 : index
    %c0_4 = arith.constant 0 : index
    %2 = vector.load %arg2[%c0_3, %c0_4] : memref<32x768xf32, #tpu.memory_space<vmem>>, vector<32x768xf32>
    %cst = arith.constant dense<0.000000e+00> : vector<8x768xf32>
    %3 = tpu.matmul %1, %2, %cst {dimension_numbers = #tpu.dot_dimension_numbers<[1], [0], [0], [1], [0, 0, 1, 1], [], []>} : vector<8x32xf32>, vector<32x768xf32>, vector<8x768xf32> -> vector<8x768xf32>
    %c0_5 = arith.constant 0 : index
    %c0_6 = arith.constant 0 : index
    %4 = vector.load %arg3[%c0_5, %c0_6] : memref<1x768xf32, #tpu.memory_space<vmem>>, vector<1x768xf32>
    %5 = vector.broadcast %4 : vector<1x768xf32> to vector<8x768xf32>
    %6 = arith.addf %3, %5 : vector<8x768xf32>
    %7 = math.tanh %6 : vector<8x768xf32>
    %c0_7 = arith.constant 0 : index
    %c0_8 = arith.constant 0 : index
    %8 = vector.load %arg4[%c0_7, %c0_8] : memref<768x128xf32, #tpu.memory_space<vmem>>, vector<768x128xf32>
    %cst_9 = arith.constant dense<0.000000e+00> : vector<8x128xf32>
    %9 = tpu.matmul %7, %8, %cst_9 {dimension_numbers = #tpu.dot_dimension_numbers<[1], [0], [0], [1], [0, 0, 1, 1], [], []>} : vector<8x768xf32>, vector<768x128xf32>, vector<8x128xf32> -> vector<8x128xf32>
    %c0_10 = arith.constant 0 : index
    %c0_11 = arith.constant 0 : index
    %10 = vector.load %arg5[%c0_10, %c0_11] : memref<1x128xf32, #tpu.memory_space<vmem>>, vector<1x128xf32>
    %11 = vector.broadcast %10 : vector<1x128xf32> to vector<8x128xf32>
    %12 = arith.addf %9, %11 : vector<8x128xf32>
    %13 = vector.broadcast %0 : f32 to vector<8x128xf32>
    %14 = arith.mulf %12, %13 : vector<8x128xf32>
    %c0_12 = arith.constant 0 : index
    %c0_13 = arith.constant 0 : index
    %15 = vector.load %arg6[%c0_12, %c0_13] : memref<8x128xf32, #tpu.memory_space<vmem>>, vector<8x128xf32>
    tpu.vector_store %arg6[%c0_12, %c0_13], %14 {strides = array<i32>} : memref<8x128xf32, #tpu.memory_space<vmem>>, vector<8x128xf32>,
    %cst_14 = arith.constant dense<0xFF800000> : vector<8xf32>
    %16 = vector.multi_reduction <maximumf>, %14, %cst_14 [1] : vector<8x128xf32> to vector<8xf32>
    %17 = vector.shape_cast %16 : vector<8xf32> to vector<8x1xf32>
    %18 = vector.broadcast %17 : vector<8x1xf32> to vector<8x128xf32>
    %19 = arith.subf %14, %18 : vector<8x128xf32>
    %20 = math.exp %19 : vector<8x128xf32>
    %cst_15 = arith.constant dense<0.000000e+00> : vector<8xf32>
    %21 = vector.multi_reduction <add>, %20, %cst_15 [1] : vector<8x128xf32> to vector<8xf32>
    %22 = vector.shape_cast %21 : vector<8xf32> to vector<8x1xf32>
    %23 = vector.broadcast %22 : vector<8x1xf32> to vector<8x128xf32>
    %24 = arith.divf %20, %23 : vector<8x128xf32>
    %c0_16 = arith.constant 0 : index
    %c0_17 = arith.constant 0 : index
    %25 = vector.load %arg7[%c0_16, %c0_17] : memref<8x128xf32, #tpu.memory_space<vmem>>, vector<8x128xf32>
    tpu.vector_store %arg7[%c0_16, %c0_17], %24 {strides = array<i32>} : memref<8x128xf32, #tpu.memory_space<vmem>>, vector<8x128xf32>,
    %cst_18 = arith.constant 5.000000e-01 : f32
    %26 = vector.broadcast %cst_18 : f32 to vector<8x768xf32>
    %27 = arith.mulf %7, %26 : vector<8x768xf32>
    %cst_19 = arith.constant 5.000000e-01 : f32
    %28 = vector.broadcast %cst_19 : f32 to vector<8x768xf32>
    %29 = arith.addf %27, %28 : vector<8x768xf32>
    %c0_20 = arith.constant 0 : index
    %c0_21 = arith.constant 0 : index
    %30 = vector.load %arg8[%c0_20, %c0_21] : memref<8x768xf32, #tpu.memory_space<vmem>>, vector<8x768xf32>
    tpu.vector_store %arg8[%c0_20, %c0_21], %29 {strides = array<i32>} : memref<8x768xf32, #tpu.memory_space<vmem>>, vector<8x768xf32>,
    return
  }
}

</mosaic_0001>

<bundles_post_ra>
// kernel: tpu_custom_call.1
= control target key start
LH: loop header
LB: loop body
LE: loop exit
PB: predicated region body
PF: predicated region fallthrough
CT: control target
= control target key end

     0   :  { %15 = vsyncpa [#allocation4], 0  ;;  %s1280_s0 = inlined_call_operand.<no memory space> [shape: f32[1,1], index: 0, kind: input, shape index: {}]   ;;  %s1281_s1 = inlined_call_operand.hbm [shape: f32[8,32], index: 1, kind: input, shape index: {}]   ;;  %s1282_s2 = inlined_call_operand.hbm [shape: f32[32,768], index: 2, kind: input, shape index: {}]   ;;  %s1283_s3 = inlined_call_operand.vmem [shape: f32[1,768], index: 3, kind: input, shape index: {}]   ;;  %s1284_s4 = inlined_call_operand.hbm [shape: f32[768,128], index: 4, kind: input, shape index: {}]   ;;  %s1285_s5 = inlined_call_operand.vmem [shape: f32[1,128], index: 5, kind: input, shape index: {}]   ;;  %s1286_s6 = inlined_call_operand.hbm [shape: f32[8,128], index: 6, kind: output, shape index: {0}]   ;;  %s1287_s7 = inlined_call_operand.hbm [shape: f32[8,128], index: 7, kind: output, shape index: {1}]   ;;  %s1288_s8 = inlined_call_operand.hbm [shape: f32[8,768], index: 8, kind: output, shape index: {2}]  }
   0x1   :  { %16 = vsyncpa [#allocation7], 0 }
   0x2   :  { %17 = vsyncpa [#allocation5], 0 }
   0x3   :  { %18 = vsyncpa [#allocation11], 0  ;;  %s1132_s27 = smov [#allocation6]   ;;  %s992_s9 = scalar_lea.hbm %s1282_s2, 3072 }
   0x4   :  { %s36_s28 = sshll.u32 %s1132_s27, 4  ;;  %p993_p0 = scmp.ne.s32.totalorder %s1282_s2, %s992_s9  ;;  %s37_s28 = int_to_ptr.vmem [resolvable:$true] %s36_s28 }
   0x5   :  { %p996_p1 = scmp.lt.u32.totalorder %s992_s9, %s1282_s2 }
   0x7   :  { %p998_p2 = pnand %p996_p1, %p993_p0 }
   0x9   :  { %1001 = shalt.err (!%p998_p2)
}
   0xa   :  { %s1002_s14 = scalar_lea.vmem %s37_s28, 3072  ;;  %p1007_p4 = scmp.lt.s32.totalorder %s37_s28, %s37_s28 }
   0xb   :  { %p1003_p3 = scmp.ne.s32.totalorder %s37_s28, %s1002_s14  ;;  %p1008_p5 = scmp.lt.s32.totalorder %s1002_s14, %s1002_s14 }
   0xd   :  { %p1009_p6 = por %p1008_p5, %p1007_p4 }
   0xf   :  { %p1010_p7 = pnand %p1009_p6, %p1003_p3 }
  0x11   :  { %1013 = shalt.err (!%p1010_p7)
}
  0x12   :  { %s1133_s15 = smov 768   ;;  %s1134_s16 = smov 48  }
  0x13   :  { %42 = dma.hbm_to_vmem [thread:$0]  %s1282_s2, 3072, %s37_s28, [#allocation7], %s1133_s15, %s1133_s15, %s1134_s16  }
  0x14   :  { %s1135_s19 = smov [#allocation3]   ;;  %s1136_s21 = smov [#allocation8]  }
  0x15   :  { %s27_s20 = sshll.u32 %s1135_s19, 4  ;;  %s50_s22 = sshll.u32 %s1136_s21, 4  ;;  %s28_s20 = int_to_ptr.vmem [resolvable:$true] %s27_s20  ;;  %s51_s22 = int_to_ptr.vmem [resolvable:$true] %s50_s22 }
  0x16   :  { %s1014_s25 = scalar_lea.hbm %s1281_s1, 128 }
  0x17   :  { %p1015_p8 = scmp.ne.s32.totalorder %s1281_s1, %s1014_s25  ;;  %p1018_p9 = scmp.lt.u32.totalorder %s1014_s25, %s1281_s1 }
  0x19   :  { %p1020_p10 = pnand %p1018_p9, %p1015_p8 }
  0x1b   :  { %1023 = shalt.err (!%p1020_p10)
}
  0x1c   :  { %s1024_s2 = scalar_lea.vmem %s28_s20, 128  ;;  %p1029_p12 = scmp.lt.s32.totalorder %s28_s20, %s28_s20 }
  0x1d   :  { %p1025_p11 = scmp.ne.s32.totalorder %s28_s20, %s1024_s2  ;;  %p1030_p13 = scmp.lt.s32.totalorder %s1024_s2, %s1024_s2 }
  0x1f   :  { %p1031_p0 = por %p1030_p13, %p1029_p12 }
  0x21   :  { %p1032_p1 = pnand %p1031_p0, %p1025_p11 }
  0x23   :  { %1035 = shalt.err (!%p1032_p1)
}
  0x24   :  { %30 = dma.hbm_to_vmem [thread:$0]  %s1281_s1, 128, %s28_s20, [#allocation4]  }
  0x25   :  { %s1036_s12 = scalar_lea.hbm %s1284_s4, 12288 }
  0x26   :  { %p1037_p2 = scmp.ne.s32.totalorder %s1284_s4, %s1036_s12  ;;  %p1040_p3 = scmp.lt.u32.totalorder %s1036_s12, %s1284_s4 }
  0x28   :  { %p1042_p4 = pnand %p1040_p3, %p1037_p2 }
  0x2a   :  { %1045 = shalt.err (!%p1042_p4)
}
  0x2b   :  { %s1046_s17 = scalar_lea.vmem %s51_s22, 12288  ;;  %p1051_p6 = scmp.lt.s32.totalorder %s51_s22, %s51_s22 }
  0x2c   :  { %p1047_p5 = scmp.ne.s32.totalorder %s51_s22, %s1046_s17  ;;  %p1052_p7 = scmp.lt.s32.totalorder %s1046_s17, %s1046_s17 }
  0x2e   :  { %p1053_p8 = por %p1052_p7, %p1051_p6 }
  0x30   :  { %p1054_p9 = pnand %p1053_p8, %p1047_p5 }
  0x32   :  { %1057 = shalt.err (!%p1054_p9)
}
  0x33   :  { %s1137_s1 = smov 128   ;;  %s1138_s18 = smov 8  }
  0x34   :  { %56 = dma.hbm_to_vmem [thread:$0]  %s1284_s4, 12288, %s51_s22, [#allocation7], %s1137_s1, %s1137_s1, %s1138_s18  }
  0x35   :  { %1124 = dma.done.wait [#allocation4], 128  }
  0x36   :  { %1125 = vsyncadd [#allocation4], 4294967168 }
  0x37   :  { %1126 = dma.done.wait [#allocation7], 15360  }
  0x38   :  { %1127 = vsyncadd [#allocation7], 4294951936  ;;  %v1139_v0 = vmov 0.0   ;;  %v71_v1 = vld [vmem:[#allocation6 + $0x8] sm:$0xff]  ;;  %v77_v2 = vld [vmem:[#allocation6 + $0x38] sm:$0xff]  ;;  %vm126_vm0 = vcmask 261120  }
  0x39   :  { %194 = vmatprep.mubr.f32.mxu0 %v1139_v0  ;;  %v70_v3 = vld [vmem:[#allocation6] sm:$0xff]  ;;  %v845_v4 = vpack.c.bf16 %v77_v2, %v71_v1  ;;  %v76_v5 = vld [vmem:[#allocation6 + $0x30] sm:$0xff]  ;;  %v83_v6 = vld [vmem:[#allocation6 + $0x68] sm:$0xff] }
  0x3a   :  { %v89_v7 = vld [vmem:[#allocation6 + $0x98] sm:$0xff]  ;;  %v847_v8 = vpack.c.bf16 %v76_v5, %v70_v3  ;;  %v82_v10 = vld [vmem:[#allocation6 + $0x60] sm:$0xff]  ;;  %v88_v11 = vld [vmem:[#allocation6 + $0x90] sm:$0xff] }
  0x3b   :  { %v849_v9 = vpack.c.bf16 %v89_v7, %v83_v6  ;;  %846 = vmatprep.subr.bf16.mxu0 %v845_v4  ;;  %v73_v12 = vld [vmem:[#allocation6 + $0x18] sm:$0xff]  ;;  %v79_v13 = vld [vmem:[#allocation6 + $0x48] sm:$0xff]  ;;  %v851_v14 = vpack.c.bf16 %v88_v11, %v82_v10  ;;  %v72_v16 = vld [vmem:[#allocation6 + $0x10] sm:$0xff] }
  0x3c   :  { %848 = vmatpush1.bf16.msra.mxu0 %v847_v8  ;;  %v853_v15 = vpack.c.bf16 %v79_v13, %v73_v12  ;;  %v78_v17 = vld [vmem:[#allocation6 + $0x40] sm:$0xff]  ;;  %v85_v18 = vld [vmem:[#allocation6 + $0x78] sm:$0xff]  ;;  %v91_v19 = vld [vmem:[#allocation6 + $0xa8] sm:$0xff] }
  0x3d   :  { %850 = vmatprep.subr.bf16.mxu0 %v849_v9  ;;  %v1225_v20 = vld [vmem:[#allocation3] sm:$0xff]  ;;  %v84_v21 = vld [vmem:[#allocation6 + $0x70] sm:$0xff]  ;;  %v90_v22 = vld [vmem:[#allocation6 + $0xa0] sm:$0xff]  ;;  %v855_v23 = vpack.c.bf16 %v78_v17, %v72_v16  ;;  %v857_v28 = vpack.c.bf16 %v91_v19, %v85_v18 }
  0x3e   :  { %v75_v24 = vld [vmem:[#allocation6 + $0x28] sm:$0xff]  ;;  %v81_v25 = vld [vmem:[#allocation6 + $0x58] sm:$0xff]  ;;  %v365_v26 = vld [vmem:[#allocation8 + $0x80] sm:$0xff]  ;;  %v859_v40 = vpack.c.bf16 %v90_v22, %v84_v21 }
  0x3f   :  { %v366_v27 = vld [vmem:[#allocation8 + $0x88] sm:$0xff]  ;;  %v349_v30 = vld [vmem:[#allocation8] sm:$0xff]  ;;  %v367_v32 = vld [vmem:[#allocation8 + $0x90] sm:$0xff]  ;;  %v861_v41 = vpack.c.bf16 %v81_v25, %v75_v24 }
  0x40   :  { %852 = vmatpush1.bf16.msra.mxu0 %v851_v14  ;;  %v869_v29 = vpack.c.bf16 %v366_v27, %v365_v26  ;;  %v350_v31 = vld [vmem:[#allocation8 + $0x8] sm:$0xff]  ;;  %v368_v34 = vld [vmem:[#allocation8 + $0x98] sm:$0xff]  ;;  %v351_v35 = vld [vmem:[#allocation8 + $0x10] sm:$0xff] }
  0x41   :  { %854 = vmatprep.subr.bf16.mxu0 %v853_v15  ;;  %v871_v33 = vpack.c.bf16 %v350_v31, %v349_v30  ;;  %v352_v36 = vld [vmem:[#allocation8 + $0x18] sm:$0xff]  ;;  %v873_v37 = vpack.c.bf16 %v368_v34, %v367_v32  ;;  %v369_v38 = vld [vmem:[#allocation8 + $0xa0] sm:$0xff]  ;;  %v370_v39 = vld [vmem:[#allocation8 + $0xa8] sm:$0xff] }
  0x42   :  { %870 = vmatprep.subr.bf16.mxu1 %v869_v29  ;;  %v74_v42 = vld [vmem:[#allocation6 + $0x20] sm:$0xff]  ;;  %v80_v43 = vld [vmem:[#allocation6 + $0x50] sm:$0xff]  ;;  %v87_v44 = vld [vmem:[#allocation6 + $0x88] sm:$0xff]  ;;  %v875_v45 = vpack.c.bf16 %v352_v36, %v351_v35  ;;  %v877_v47 = vpack.c.bf16 %v370_v39, %v369_v38 }
  0x43   :  { %736 = vmatmul.mubr.msk.f32.vlgmr.msra.gmra.mrb[0].mxu0 %vm126_vm0, %v1225_v20  ;;  %872 = vmatpush3.bf16.msra.mxu1 %v871_v33  ;;  %v93_v46 = vld [vmem:[#allocation6 + $0xb8] sm:$0xff]  ;;  %v353_v48 = vld [vmem:[#allocation8 + $0x20] sm:$0xff]  ;;  %v354_v49 = vld [vmem:[#allocation8 + $0x28] sm:$0xff]  ;;  %v863_v52 = vpack.c.bf16 %v80_v43, %v74_v42 }
  0x44   :  { %856 = vmatpush1.bf16.msra.mxu0 %v855_v23  ;;  %265 = vmatprep.mubr.f32.mxu0 %v1139_v0  ;;  %v371_v50 = vld [vmem:[#allocation8 + $0xb0] sm:$0xff]  ;;  %v372_v51 = vld [vmem:[#allocation8 + $0xb8] sm:$0xff]  ;;  %v865_v53 = vpack.c.bf16 %v93_v46, %v87_v44  ;;  %v86_v54 = vld [vmem:[#allocation6 + $0x80] sm:$0xff]  ;;  %v879_v56 = vpack.c.bf16 %v354_v49, %v353_v48 }
  0x45   :  { %858 = vmatprep.subr.bf16.mxu0 %v857_v28  ;;  %874 = vmatprep.subr.bf16.mxu1 %v873_v37  ;;  %v92_v55 = vld [vmem:[#allocation6 + $0xb0] sm:$0xff]  ;;  %v397_v57 = vld [vmem:[#allocation8 + $0x180] sm:$0xff]  ;;  %v398_v58 = vld [vmem:[#allocation8 + $0x188] sm:$0xff]  ;;  %v881_v59 = vpack.c.bf16 %v372_v51, %v371_v50 }
  0x46   :  { %v355_v60 = vld [vmem:[#allocation8 + $0x30] sm:$0xff]  ;;  %v356_v61 = vld [vmem:[#allocation8 + $0x38] sm:$0xff]  ;;  %v373_v62 = vld [vmem:[#allocation8 + $0xc0] sm:$0xff]  ;;  %v867_v1 = vpack.c.bf16 %v92_v55, %v86_v54  ;;  %v901_v2 = vpack.c.bf16 %v398_v58, %v397_v57 }
  0x47   :  { %876 = vmatpush3.bf16.msra.mxu1 %v875_v45  ;;  %v374_v63 = vld [vmem:[#allocation8 + $0xc8] sm:$0xff]  ;;  %v381_v3 = vld [vmem:[#allocation8 + $0x100] sm:$0xff]  ;;  %v883_v5 = vpack.c.bf16 %v356_v61, %v355_v60  ;;  %v399_v6 = vld [vmem:[#allocation8 + $0x190] sm:$0xff] }
  0x48   :  { %860 = vmatpush1.bf16.msra.mxu0 %v859_v40  ;;  %878 = vmatprep.subr.bf16.mxu1 %v877_v47  ;;  %v382_v4 = vld [vmem:[#allocation8 + $0x108] sm:$0xff]  ;;  %v400_v7 = vld [vmem:[#allocation8 + $0x198] sm:$0xff]  ;;  %v885_v8 = vpack.c.bf16 %v374_v63, %v373_v62  ;;  %v383_v11 = vld [vmem:[#allocation8 + $0x110] sm:$0xff] }
  0x49   :  { %862 = vmatprep.subr.bf16.mxu0 %v861_v41  ;;  %v903_v9 = vpack.c.bf16 %v382_v4, %v381_v3  ;;  %v905_v10 = vpack.c.bf16 %v400_v7, %v399_v6  ;;  %v384_v12 = vld [vmem:[#allocation8 + $0x118] sm:$0xff]  ;;  %v357_v13 = vld [vmem:[#allocation8 + $0x40] sm:$0xff]  ;;  %v358_v14 = vld [vmem:[#allocation8 + $0x48] sm:$0xff] }
  0x4a   :  { %v401_v15 = vld [vmem:[#allocation8 + $0x1a0] sm:$0xff]  ;;  %v887_v16 = vpack.c.bf16 %v358_v14, %v357_v13  ;;  %v402_v17 = vld [vmem:[#allocation8 + $0x1a8] sm:$0xff]  ;;  %v375_v23 = vld [vmem:[#allocation8 + $0xd0] sm:$0xff] }
  0x4b   :  { %737 = vmatmul.mubr.msk.f32.vlgmr.msra.gmra.mrb[2].mxu0 %vm126_vm0, %v1225_v20  ;;  %880 = vmatpush3.bf16.msra.mxu1 %v879_v56  ;;  %v385_v18 = vld [vmem:[#allocation8 + $0x120] sm:$0xff]  ;;  %v386_v19 = vld [vmem:[#allocation8 + $0x128] sm:$0xff]  ;;  %v909_v21 = vpack.c.bf16 %v402_v17, %v401_v15  ;;  %v376_v24 = vld [vmem:[#allocation8 + $0xd8] sm:$0xff] }
  0x4c   :  { %864 = vmatpush1.bf16.msra.mxu0 %v863_v52  ;;  %336 = vmatprep.mubr.f32.mxu0 %v1139_v0  ;;  %v907_v0 = vpack.c.bf16 %v384_v12, %v383_v11  ;;  %v911_v22 = vpack.c.bf16 %v386_v19, %v385_v18  ;;  %v889_v25 = vpack.c.bf16 %v376_v24, %v375_v23  ;;  %v359_v26 = vld [vmem:[#allocation8 + $0x50] sm:$0xff]  ;;  %v404_v29 = vld [vmem:[#allocation8 + $0x1b8] sm:$0xff]  ;;  %v377_v34 = vld [vmem:[#allocation8 + $0xe0] sm:$0xff] }
  0x4d   :  { %866 = vmatprep.subr.bf16.mxu0 %v865_v53  ;;  %882 = vmatprep.subr.bf16.mxu1 %v881_v59  ;;  %v403_v27 = vld [vmem:[#allocation8 + $0x1b0] sm:$0xff]  ;;  %v388_v31 = vld [vmem:[#allocation8 + $0x138] sm:$0xff]  ;;  %v378_v35 = vld [vmem:[#allocation8 + $0xe8] sm:$0xff] }
  0x4e   :  { %v387_v30 = vld [vmem:[#allocation8 + $0x130] sm:$0xff]  ;;  %v913_v32 = vpack.c.bf16 %v404_v29, %v403_v27  ;;  %v893_v36 = vpack.c.bf16 %v378_v35, %v377_v34  ;;  %v361_v37 = vld [vmem:[#allocation8 + $0x60] sm:$0xff]  ;;  %v362_v38 = vld [vmem:[#allocation8 + $0x68] sm:$0xff] }
  0x4f   :  { %884 = vmatpush3.bf16.msra.mxu1 %v883_v5  ;;  %v915_v33 = vpack.c.bf16 %v388_v31, %v387_v30  ;;  %v405_v39 = vld [vmem:[#allocation8 + $0x1c0] sm:$0xff]  ;;  %v895_v40 = vpack.c.bf16 %v362_v38, %v361_v37  ;;  %v406_v41 = vld [vmem:[#allocation8 + $0x1c8] sm:$0xff]  ;;  %v379_v46 = vld [vmem:[#allocation8 + $0xf0] sm:$0xff] }
  0x50   :  { %868 = vmatpush1.bf16.msra.mxu0 %v867_v1  ;;  %886 = vmatprep.subr.bf16.mxu1 %v885_v8  ;;  %v389_v42 = vld [vmem:[#allocation8 + $0x140] sm:$0xff]  ;;  %v390_v43 = vld [vmem:[#allocation8 + $0x148] sm:$0xff]  ;;  %v917_v44 = vpack.c.bf16 %v406_v41, %v405_v39  ;;  %v380_v47 = vld [vmem:[#allocation8 + $0xf8] sm:$0xff] }
  0x51   :  { %902 = vmatprep.subr.bf16.mxu0 %v901_v2  ;;  %v919_v45 = vpack.c.bf16 %v390_v43, %v389_v42  ;;  %v897_v48 = vpack.c.bf16 %v380_v47, %v379_v46  ;;  %v363_v49 = vld [vmem:[#allocation8 + $0x70] sm:$0xff]  ;;  %v364_v50 = vld [vmem:[#allocation8 + $0x78] sm:$0xff]  ;;  %v429_v58 = vld [vmem:[#allocation8 + $0x280] sm:$0xff] }
  0x52   :  { %v407_v51 = vld [vmem:[#allocation8 + $0x1d0] sm:$0xff]  ;;  %v899_v52 = vpack.c.bf16 %v364_v50, %v363_v49  ;;  %v408_v53 = vld [vmem:[#allocation8 + $0x1d8] sm:$0xff]  ;;  %v430_v59 = vld [vmem:[#allocation8 + $0x288] sm:$0xff] }
  0x53   :  { %738 = vmatmul.mubr.msk.f32.vlgmr.msra.gmra.mrb[4].mxu0 %vm126_vm0, %v1225_v20  ;;  %888 = vmatpush3.bf16.msra.mxu1 %v887_v16  ;;  %v360_v20 = vld [vmem:[#allocation8 + $0x58] sm:$0xff]  ;;  %v391_v54 = vld [vmem:[#allocation8 + $0x150] sm:$0xff]  ;;  %v921_v56 = vpack.c.bf16 %v408_v53, %v407_v51  ;;  %v933_v60 = vpack.c.bf16 %v430_v59, %v429_v58  ;;  %v409_v61 = vld [vmem:[#allocation8 + $0x1e0] sm:$0xff] }
  0x54   :  { %904 = vmatpush3.bf16.msra.mxu0 %v903_v9  ;;  %v891_v28 = vpack.c.bf16 %v360_v20, %v359_v26  ;;  %890 = vmatprep.subr.bf16.mxu1 %v889_v25  ;;  %v392_v55 = vld [vmem:[#allocation8 + $0x158] sm:$0xff]  ;;  %v410_v62 = vld [vmem:[#allocation8 + $0x1e8] sm:$0xff]  ;;  %v393_v1 = vld [vmem:[#allocation8 + $0x160] sm:$0xff] }
  0x55   :  { %906 = vmatprep.subr.bf16.mxu0 %v905_v10  ;;  %v923_v57 = vpack.c.bf16 %v392_v55, %v391_v54  ;;  %v925_v63 = vpack.c.bf16 %v410_v62, %v409_v61  ;;  %v394_v2 = vld [vmem:[#allocation8 + $0x168] sm:$0xff]  ;;  %v411_v4 = vld [vmem:[#allocation8 + $0x1f0] sm:$0xff]  ;;  %v412_v5 = vld [vmem:[#allocation8 + $0x1f8] sm:$0xff]  ;;  %v96_v10 = vlaneseq }
  0x56   :  { %v927_v3 = vpack.c.bf16 %v394_v2, %v393_v1  ;;  %v929_v6 = vpack.c.bf16 %v412_v5, %v411_v4  ;;  %v395_v7 = vld [vmem:[#allocation8 + $0x170] sm:$0xff]  ;;  %v396_v8 = vld [vmem:[#allocation8 + $0x178] sm:$0xff]  ;;  %v413_v29 = vld [vmem:[#allocation8 + $0x200] sm:$0xff] }
  0x57   :  { %892 = vmatpush3.bf16.msra.mxu1 %v891_v28  ;;  %v931_v9 = vpack.c.bf16 %v396_v8, %v395_v7  ;;  %v97_v11 = vshrl.u32 %v96_v10, 7  ;;  %v414_v30 = vld [vmem:[#allocation8 + $0x208] sm:$0xff]  ;;  %v416_v41 = vld [vmem:[#allocation8 + $0x218] sm:$0xff]  ;;  %v417_v53 = vld [vmem:[#allocation8 + $0x220] sm:$0xff] }
  0x58   :  { %908 = vmatpush3.bf16.msra.mxu0 %v907_v0  ;;  %894 = vmatprep.subr.bf16.mxu1 %v893_v36  ;;  %v94_v0 = vld [vmem:[%s1283_s3] sm:$0x3f]  ;;  %v935_v35 = vpack.c.bf16 %v414_v30, %v413_v29  ;;  %v418_v54 = vld [vmem:[#allocation8 + $0x228] sm:$0xff] }
  0x59   :  { %910 = vmatprep.subr.bf16.mxu0 %v909_v21  ;;  %v98_v12 = vsub.s32 0, %v97_v11  ;;  %v102_v13 = vsub.s32 1, %v97_v11  ;;  %v106_v19 = vsub.s32 2, %v97_v11  ;;  %v114_v27 = vsub.s32 4, %v97_v11  ;;  %v420_v1 = vld [vmem:[#allocation8 + $0x238] sm:$0xff]  ;;  %v438_v4 = vld [vmem:[#allocation8 + $0x2c8] sm:$0xff] }
  0x5a   :  { %v118_v31 = vsub.s32 5, %v97_v11  ;;  %v943_v59 = vpack.c.bf16 %v418_v54, %v417_v53  ;;  %v422_v10 = vld [vmem:[#allocation8 + $0x248] sm:$0xff]  ;;  %v444_v29 = vld [vmem:[#allocation8 + $0x2f8] sm:$0xff] }
  0x5b   :  { %896 = vmatpush3.bf16.msra.mxu1 %v895_v40  ;;  %v99_v14 = vrot.slane %v94_v0, %v98_v12  ;;  %v103_v15 = vrot.slane %v94_v0, %v102_v13  ;;  %v107_v23 = vrot.slane %v94_v0, %v106_v19  ;;  %v115_v36 = vrot.slane %v94_v0, %v114_v27  ;;  %v415_v40 = vld [vmem:[#allocation8 + $0x210] sm:$0xff]  ;;  %v440_v12 = vld [vmem:[#allocation8 + $0x2d8] sm:$0xff]  ;;  %v426_v27 = vld [vmem:[#allocation8 + $0x268] sm:$0xff] }
  0x5c   :  { %912 = vmatpush3.bf16.msra.mxu0 %v911_v22  ;;  %898 = vmatprep.subr.bf16.mxu1 %v897_v48  ;;  %v110_v22 = vsub.s32 3, %v97_v11  ;;  %v119_v42 = vrot.slane %v94_v0, %v118_v31  ;;  %v939_v49 = vpack.c.bf16 %v416_v41, %v415_v40  ;;  %v439_v11 = vld [vmem:[#allocation8 + $0x2d0] sm:$0xff] }
  0x5d   :  { %914 = vmatprep.subr.bf16.mxu0 %v913_v32  ;;  %v431_v32 = vld [vmem:[#allocation8 + $0x290] sm:$0xff] }
  0x5e   :  { %v111_v24 = vrot.slane %v94_v0, %v110_v22  ;;  %v442_v22 = vld [vmem:[#allocation8 + $0x2e8] sm:$0xff] }
  0x5f   :  { %900 = vmatpush3.bf16.msra.mxu1 %v899_v52 }
  0x60   :  { %916 = vmatpush3.bf16.msra.mxu0 %v915_v33  ;;  %934 = vmatprep.subr.bf16.mxu1 %v933_v60  ;;  %v432_v33 = vld [vmem:[#allocation8 + $0x298] sm:$0xff] }
  0x61   :  { %918 = vmatprep.subr.bf16.mxu0 %v917_v44  ;;  %v937_v39 = vpack.c.bf16 %v432_v33, %v431_v32  ;;  %v433_v44 = vld [vmem:[#allocation8 + $0x2a0] sm:$0xff]  ;;  %v427_v32 = vld [vmem:[#allocation8 + $0x270] sm:$0xff]  ;;  %v428_v33 = vld [vmem:[#allocation8 + $0x278] sm:$0xff] }
  0x64   :  { %920 = vmatpush3.bf16.msra.mxu0 %v919_v45  ;;  %v434_v45 = vld [vmem:[#allocation8 + $0x2a8] sm:$0xff] }
  0x65   :  { %922 = vmatprep.subr.bf16.mxu0 %v921_v56  ;;  %v941_v52 = vpack.c.bf16 %v434_v45, %v433_v44  ;;  %v435_v56 = vld [vmem:[#allocation8 + $0x2b0] sm:$0xff] }
  0x68   :  { %924 = vmatpush3.bf16.msra.mxu0 %v923_v57  ;;  %v436_v57 = vld [vmem:[#allocation8 + $0x2b8] sm:$0xff] }
  0x69   :  { %926 = vmatprep.subr.bf16.mxu0 %v925_v63  ;;  %v945_v62 = vpack.c.bf16 %v436_v57, %v435_v56  ;;  %v419_v63 = vld [vmem:[#allocation8 + $0x230] sm:$0xff] }
  0x6a   :  { %v947_v7 = vpack.c.bf16 %v420_v1, %v419_v63 }
  0x6c   :  { %928 = vmatpush3.bf16.msra.mxu0 %v927_v3  ;;  %v437_v3 = vld [vmem:[#allocation8 + $0x2c0] sm:$0xff] }
  0x6d   :  { %930 = vmatprep.subr.bf16.mxu0 %v929_v6  ;;  %v949_v8 = vpack.c.bf16 %v438_v4, %v437_v3 }
  0x70   :  { %932 = vmatpush3.bf16.msra.mxu0 %v931_v9  ;;  %v421_v9 = vld [vmem:[#allocation8 + $0x240] sm:$0xff] }
  0x71   :  { %v951_v13 = vpack.c.bf16 %v422_v10, %v421_v9 }
 0x116   :  { %v196_v16 = vpop.f32.mrb[0].mxu0 }
 0x117   :  { %v197_v17 = vadd.f32 %v196_v16, %v99_v14  ;;  %v198_v18 = vpop.f32.mrb[1].mxu0  ;;  %v953_v16 = vpack.c.bf16 %v440_v12, %v439_v11 }
 0x118   :  { %v199_v21 = vadd.f32 %v198_v18, %v103_v15  ;;  %v424_v18 = vld [vmem:[#allocation8 + $0x258] sm:$0xff] }
 0x119   :  { %976 = vtanh.f32 %v197_v17  ;;  %v423_v17 = vld [vmem:[#allocation8 + $0x250] sm:$0xff] }
 0x11a   :  { %978 = vtanh.f32 %v199_v21  ;;  %v441_v21 = vld [vmem:[#allocation8 + $0x2e0] sm:$0xff] }
 0x11e   :  { %v267_v25 = vpop.f32.mrb[2].mxu0 }
 0x11f   :  { %v268_v26 = vadd.f32 %v267_v25, %v107_v23  ;;  %v269_v20 = vpop.f32.mrb[3].mxu0  ;;  %v955_v25 = vpack.c.bf16 %v424_v18, %v423_v17 }
 0x120   :  { %v270_v28 = vadd.f32 %v269_v20, %v111_v24  ;;  %v425_v20 = vld [vmem:[#allocation8 + $0x260] sm:$0xff] }
 0x121   :  { %980 = vtanh.f32 %v268_v26  ;;  %v957_v26 = vpack.c.bf16 %v442_v22, %v441_v21  ;;  %v959_v30 = vpack.c.bf16 %v426_v27, %v425_v20 }
 0x122   :  { %982 = vtanh.f32 %v270_v28  ;;  %v443_v28 = vld [vmem:[#allocation8 + $0x2f0] sm:$0xff] }
 0x123   :  { %v977_v34 = vpop.eup %976  ;;  %v961_v31 = vpack.c.bf16 %v444_v29, %v443_v28 }
 0x124   :  { %v979_v37 = vpop.eup %978  ;;  %v675_v38 = vmul.f32 0.5, %v977_v34 }
 0x125   :  { %v676_v43 = vmul.f32 0.5, %v979_v37  ;;  %516 = vmatprep.mubr.f32.mxu1 %v979_v37 }
 0x126   :  { %v681_v46 = vadd.f32 0.5, %v675_v38  ;;  %517 = vmatmul.mubr.f32.vlgmr.msra.gmra.mrb[0].mxu1 %v977_v34  ;;  %v338_v47 = vpop.f32.mrb[4].mxu0  ;;  %v963_v34 = vpack.c.bf16 %v428_v33, %v427_v32  ;;  %v739_v38 = vld [vmem:[%s1285_s5] ss:$0 sm:$0xff]  ;;  %s1140_s5 = smov [#allocation9]  }
 0x127   :  { %v682_v48 = vadd.f32 0.5, %v676_v43  ;;  %936 = vmatpush3.bf16.msra.mxu1 %v935_v35  ;;  %v339_v50 = vadd.f32 %v338_v47, %v115_v36  ;;  %v340_v51 = vpop.f32.mrb[5].mxu0  ;;  %v662_v47 = vstv %s1280_s0  ;;  %s699_s25 = sshll.u32 %s1140_s5, 4  ;;  %s700_s25 = int_to_ptr.vmem [resolvable:$true] %s699_s25 }
 0x128   :  { %687 = vst [vmem:[#allocation12] sm:$0xff] %v681_v46  ;;  %938 = vmatprep.subr.bf16.mxu1 %v937_v39  ;;  %v341_v55 = vadd.f32 %v340_v51, %v119_v42  ;;  %s1058_s26 = scalar_lea.vmem %s700_s25, 128  ;;  %p1063_p11 = scmp.lt.s32.totalorder %s700_s25, %s700_s25 }
 0x129   :  { %688 = vst [vmem:[#allocation12 + $0x8] sm:$0xff] %v682_v48  ;;  %984 = vtanh.f32 %v339_v50  ;;  %p1059_p10 = scmp.ne.s32.totalorder %s700_s25, %s1058_s26  ;;  %p1064_p12 = scmp.lt.s32.totalorder %s1058_s26, %s1058_s26 }
 0x12a   :  { %986 = vtanh.f32 %v341_v55 }
 0x12b   :  { %v981_v58 = vpop.eup %980  ;;  %940 = vmatpush3.bf16.msra.mxu1 %v939_v49  ;;  %p1065_p13 = por %p1064_p12, %p1063_p11 }
 0x12c   :  { %v983_v60 = vpop.eup %982  ;;  %v677_v61 = vmul.f32 0.5, %v981_v58  ;;  %942 = vmatprep.subr.bf16.mxu1 %v941_v52 }
 0x12d   :  { %v678_v2 = vmul.f32 0.5, %v983_v60  ;;  %586 = vmatprep.mubr.f32.mxu0 %v983_v60  ;;  %p1066_p0 = pnand %p1065_p13, %p1059_p10 }
 0x12e   :  { %v683_v5 = vadd.f32 0.5, %v677_v61  ;;  %587 = vmatmul.mubr.f32.vlgmr.msra.gmra.mrb[6].mxu0 %v981_v58 }
 0x12f   :  { %v684_v6 = vadd.f32 0.5, %v678_v2  ;;  %944 = vmatpush3.bf16.msra.mxu1 %v943_v59 }
 0x130   :  { %689 = vst [vmem:[#allocation12 + $0x10] sm:$0xff] %v683_v5  ;;  %946 = vmatprep.subr.bf16.mxu1 %v945_v62 }
 0x131   :  { %690 = vst [vmem:[#allocation12 + $0x18] sm:$0xff] %v684_v6 }
 0x133   :  { %v985_v0 = vpop.eup %984  ;;  %948 = vmatpush3.bf16.msra.mxu1 %v947_v7 }
 0x134   :  { %v987_v14 = vpop.eup %986  ;;  %v679_v15 = vmul.f32 0.5, %v985_v0  ;;  %950 = vmatprep.subr.bf16.mxu1 %v949_v8 }
 0x135   :  { %v680_v19 = vmul.f32 0.5, %v987_v14  ;;  %656 = vmatprep.mubr.f32.mxu1 %v987_v14 }
 0x136   :  { %v685_v23 = vadd.f32 0.5, %v679_v15 }
 0x137   :  { %v686_v24 = vadd.f32 0.5, %v680_v19  ;;  %952 = vmatpush3.bf16.msra.mxu1 %v951_v13 }
 0x138   :  { %691 = vst [vmem:[#allocation12 + $0x20] sm:$0xff] %v685_v23  ;;  %954 = vmatprep.subr.bf16.mxu1 %v953_v16 }
 0x139   :  { %692 = vst [vmem:[#allocation12 + $0x28] sm:$0xff] %v686_v24 }
 0x13b   :  { %956 = vmatpush3.bf16.msra.mxu1 %v955_v25 }
 0x13c   :  { %958 = vmatprep.subr.bf16.mxu1 %v957_v26 }
 0x13f   :  { %960 = vmatpush3.bf16.msra.mxu1 %v959_v30 }
 0x140   :  { %962 = vmatprep.subr.bf16.mxu1 %v961_v31 }
 0x143   :  { %964 = vmatpush3.bf16.msra.mxu1 %v963_v34 }
 0x146   :  { %657 = vmatmul.mubr.f32.vlgmr.msra.gmra.mrb[2].mxu1 %v985_v0 }
 0x1f9   :  { %v772_v35 = vpop.f32.mrb[0].mxu1 }
 0x1fa   :  { %v773_v36 = vpop.f32.mrb[1].mxu1 }
 0x1fb   :  { %v774_v37 = vadd.f32 %v773_v36, %v772_v35 }
 0x1fd   :  { %v519_v41 = vadd.f32 %v774_v37, %v739_v38 }
 0x201   :  { %v807_v39 = vpop.f32.mrb[6].mxu0 }
 0x202   :  { %v808_v40 = vpop.f32.mrb[7].mxu0 }
 0x203   :  { %v809_v42 = vadd.f32 %v808_v40, %v807_v39 }
 0x205   :  { %v589_v43 = vadd.f32 %v809_v42, %v519_v41 }
 0x219   :  { %v842_v44 = vpop.f32.mrb[2].mxu1 }
 0x21a   :  { %v843_v45 = vpop.f32.mrb[3].mxu1 }
 0x21b   :  { %v844_v46 = vadd.f32 %v843_v45, %v842_v44 }
 0x21d   :  { %v659_v48 = vadd.f32 %v844_v46, %v589_v43 }
 0x21f   :  { %v663_v49 = vmul.f32 %v662_v47, %v659_v48 }
 0x221   :  { %665 = vmax.xlane.f32.xlu0 %v663_v49  ;;  %664 = vst [vmem:[#allocation9] sm:$0xff] %v663_v49 }
 0x2ae   :  { %v666_v50 = vpop.xlane.xlu0 %665 }
 0x2af   :  { %v667_v51 = vsub.f32 %v663_v49, %v666_v50 }
 0x2b1   :  { %v668_v52 = vmul.f32 1.442695, %v667_v51 }
 0x2b3   :  { %988 = vpow2.f32 %v668_v52 }
 0x2bd   :  { %v989_v53 = vpop.eup %988 }
 0x2be   :  { %670 = vadd.xlane.f32.xlu0 %v989_v53 }
 0x2bf   :  { %1069 = shalt.err (!%p1066_p0)
}
 0x2c0   :  { %s1070_s29 = scalar_lea.hbm %s1286_s6, 128 }
 0x2c1   :  { %p1071_p1 = scmp.ne.s32.totalorder %s1286_s6, %s1070_s29  ;;  %p1074_p2 = scmp.lt.u32.totalorder %s1070_s29, %s1286_s6 }
 0x2c3   :  { %p1076_p3 = pnand %p1074_p2, %p1071_p1 }
 0x2c5   :  { %1079 = shalt.err (!%p1076_p3)
}
 0x2c6   :  { %702 = dma.vmem_to_hbm [thread:$0]  %s700_s25, 128, %s1286_s6, [#allocation5]  }
 0x2c7   :  { %s1141_s12 = smov [#allocation10]   ;;  %s1142_s14 = smov [#allocation12]  }
 0x2c8   :  { %s709_s13 = sshll.u32 %s1141_s12, 4  ;;  %s719_s15 = sshll.u32 %s1142_s14, 4  ;;  %s710_s13 = int_to_ptr.vmem [resolvable:$true] %s709_s13  ;;  %s720_s15 = int_to_ptr.vmem [resolvable:$true] %s719_s15 }
 0x2c9   :  { %s1080_s16 = scalar_lea.vmem %s710_s13, 128  ;;  %p1085_p5 = scmp.lt.s32.totalorder %s710_s13, %s710_s13 }
 0x2ca   :  { %p1081_p4 = scmp.ne.s32.totalorder %s710_s13, %s1080_s16  ;;  %p1086_p6 = scmp.lt.s32.totalorder %s1080_s16, %s1080_s16 }
 0x2cc   :  { %p1087_p7 = por %p1086_p6, %p1085_p5 }
 0x2ce   :  { %p1088_p8 = pnand %p1087_p7, %p1081_p4 }
 0x34b   :  { %v671_v54 = vpop.xlane.xlu0 %670 }
 0x34c   :  { %990 = vrcp.f32 %v671_v54 }
 0x356   :  { %v991_v55 = vpop.eup %990 }
 0x357   :  { %v673_v56 = vmul.f32 %v991_v55, %v989_v53 }
 0x359   :  { %674 = vst [vmem:[#allocation10] sm:$0xff] %v673_v56 }
 0x35a   :  { %1091 = shalt.err (!%p1088_p8)
}
 0x35b   :  { %s1092_s1 = scalar_lea.hbm %s1287_s7, 128 }
 0x35c   :  { %p1093_p9 = scmp.ne.s32.totalorder %s1287_s7, %s1092_s1  ;;  %p1096_p10 = scmp.lt.u32.totalorder %s1092_s1, %s1287_s7 }
 0x35e   :  { %p1098_p11 = pnand %p1096_p10, %p1093_p9 }
 0x360   :  { %1101 = shalt.err (!%p1098_p11)
}
 0x361   :  { %712 = dma.vmem_to_hbm [thread:$0]  %s710_s13, 128, %s1287_s7, [#allocation11]  }
 0x362   :  { %s1102_s22 = scalar_lea.vmem %s720_s15, 768  ;;  %p1107_p13 = scmp.lt.s32.totalorder %s720_s15, %s720_s15 }
 0x363   :  { %p1103_p12 = scmp.ne.s32.totalorder %s720_s15, %s1102_s22  ;;  %p1108_p0 = scmp.lt.s32.totalorder %s1102_s22, %s1102_s22 }
 0x365   :  { %p1109_p1 = por %p1108_p0, %p1107_p13 }
 0x367   :  { %p1110_p2 = pnand %p1109_p1, %p1103_p12 }
 0x369   :  { %1113 = shalt.err (!%p1110_p2)
}
 0x36a   :  { %s1114_s5 = scalar_lea.hbm %s1288_s8, 768 }
 0x36b   :  { %p1115_p3 = scmp.ne.s32.totalorder %s1288_s8, %s1114_s5  ;;  %p1118_p4 = scmp.lt.u32.totalorder %s1114_s5, %s1288_s8 }
 0x36d   :  { %p1120_p5 = pnand %p1118_p4, %p1115_p3 }
 0x36f   :  { %1123 = shalt.err (!%p1120_p5)
}
 0x370   :  { %722 = dma.vmem_to_hbm [thread:$0]  %s720_s15, 768, %s1288_s8, [#allocation11]  }
 0x371   :  { %1128 = dma.done.wait [#allocation5], 128  }
 0x372   :  { %1129 = vsyncadd [#allocation5], 4294967168 }
 0x373   :  { %1130 = dma.done.wait [#allocation11], 896  }
 0x374   :  { %1131 = vsyncadd [#allocation11], 4294966400 }
 0x375   :  { %732 = vsyncpa [#allocation4], 1 }
 0x376   :  { %733 = vsyncpa [#allocation7], 1 }
 0x377   :  { %734 = vsyncpa [#allocation5], 1 }
 0x378   :  { %735 = vsyncpa [#allocation11], 1 }

</bundles_post_ra>
